<compile_context>
chip_gen: v7x
topology: tpu7x:2x2x1
jax: 0.10.0
libtpu: 0.0.40
codegen_flags: <defaults>
</compile_context>

<pallas_src>
import jax
import jax.numpy as jnp
from jax import lax
from jax.experimental import pallas as pl
from jax.experimental.pallas import tpu as pltpu


# ---------------------------------------------------------------------------
# integer-hash constants (as int32 two's-complement Python ints)
# ---------------------------------------------------------------------------
def _i32(c):
    c &= 0xFFFFFFFF
    return c - (1 << 32) if c >= (1 << 31) else c


_PHI = _i32(0x9E3779B9)   # golden-ratio increment (seed mixing)
_M1 = _i32(0x7FEB352D)    # lowbias32 multipliers (Chris Wellons)
_M2 = _i32(0x846CA68B)

# Acklam inverse-normal-CDF coefficients (|rel err| ~ 1.2e-9).
_A = (-3.969683028665376e+01, 2.209460984245205e+02, -2.759285104469687e+02,
      1.383577518672690e+02, -3.066479806614716e+01, 2.506628277459239e+00)
_B = (-5.447609879822406e+01, 1.615858368580409e+02, -1.556989798598866e+02,
      6.680131188771972e+01, -1.328068155288572e+01)
_C = (-7.784894002430293e-03, -3.223964580411365e-01, -2.400758277161838e+00,
      -2.549732539343734e+00, 4.374664141464968e+00, 2.938163982698783e+00)
_D = (7.784695709041462e-03, 3.224671290700398e-01, 2.445134137142996e+00,
      3.754408661907416e+00)
_P_LOW = 0.02425


def _lsr(v, n):
    """Logical (unsigned) right shift on int32 vectors."""
    return lax.shift_right_logical(v, jnp.full_like(v, n))


def _mix32(v):
    """lowbias32: xor-shift-multiply integer hash (wrapping int32 arithmetic)."""
    v = v ^ _lsr(v, 16)
    v = v * jnp.int32(_M1)
    v = v ^ _lsr(v, 15)
    v = v * jnp.int32(_M2)
    v = v ^ _lsr(v, 16)
    return v


def _poly(coeffs, q):
    r = jnp.float32(coeffs[0])
    for c in coeffs[1:]:
        r = r * q + jnp.float32(c)
    return r


def _inv_normal_cdf(p):
    """Acklam's rational approximation of Phi^{-1}(p), p in (0, 1)."""
    # central region: |p - 0.5| <= 0.5 - P_LOW
    q = p - 0.5
    r = q * q
    z_centre = (_poly(_A, r) * q) / (_poly(_B, r) * r + 1.0)
    # symmetric tails (one log + one sqrt per element)
    pt = jnp.minimum(p, 1.0 - p)
    qt = jnp.sqrt(-2.0 * jnp.log(pt))
    z_tail = _poly(_C, qt) / (_poly(_D, qt) * qt + 1.0)
    z_tail = jnp.where(p > 0.5, -z_tail, z_tail)
    return jnp.where(pt < _P_LOW, z_tail, z_centre)


# ---------------------------------------------------------------------------
# kernel
# ---------------------------------------------------------------------------
def _normal_proposal_kernel(seed_ref, sigma_ref, x_ref, o_ref):
    tile_r, lane = x_ref.shape
    pid = pl.program_id(0)

    # Unique 32-bit counter per element: flat index into the padded slab
    # (independent of the tile size chosen for a fixed lane width).
    row = lax.broadcasted_iota(jnp.int32, (tile_r, lane), 0)
    col = lax.broadcasted_iota(jnp.int32, (tile_r, lane), 1)
    idx = (pid * tile_r + row) * lane + col

    # Counter-based PRNG: double lowbias32 hash of (seed, index).
    v = idx ^ (seed_ref[0] * jnp.int32(_PHI))
    v = _mix32(_mix32(v))

    # Top 24 bits -> uniform in (0, 1), then inverse CDF -> standard normal.
    u = (_lsr(v, 8).astype(jnp.float32) + 0.5) * jnp.float32(1.0 / (1 << 24))
    z = _inv_normal_cdf(u)

    o_ref[...] = x_ref[...] + sigma_ref[0] * z


# ---------------------------------------------------------------------------
# wrapper
# ---------------------------------------------------------------------------
def _round_up(n, m):
    return ((n + m - 1) // m) * m


def normal_proposal(x, sigma, seed, *, lane=1024, max_tile_rows=512):
    """Pallas equivalent of NormalProposal(sigma).forward(x) (any shape)."""
    orig_shape = x.shape
    xf = jnp.asarray(x, jnp.float32).reshape(-1)
    total = xf.shape[0]

    rows = pl.cdiv(total, lane)
    tile_r = min(max_tile_rows, _round_up(rows, 8))      # (8,128)-aligned tiles
    rows_pad = _round_up(rows, tile_r)
    pad = rows_pad * lane - total
    if pad:
        xf = jnp.pad(xf, (0, pad))
    x2 = xf.reshape(rows_pad, lane)                      # lane-dense slab

    seed_arr = jnp.asarray([seed], dtype=jnp.int32)
    sigma_arr = jnp.asarray([sigma], dtype=jnp.float32)

    out2 = pl.pallas_call(
        _normal_proposal_kernel,
        grid=(rows_pad // tile_r,),
        in_specs=[
            pl.BlockSpec(memory_space=pltpu.MemorySpace.SMEM),   # seed scalar
            pl.BlockSpec(memory_space=pltpu.MemorySpace.SMEM),   # sigma scalar
            pl.BlockSpec((tile_r, lane), lambda i: (i, 0)),      # x tile
        ],
        out_specs=pl.BlockSpec((tile_r, lane), lambda i: (i, 0)),
        out_shape=jax.ShapeDtypeStruct((rows_pad, lane), jnp.float32),
        compiler_params=pltpu.CompilerParams(
            dimension_semantics=("parallel",)),
    )(seed_arr, sigma_arr, x2)

    return out2.reshape(-1)[:total].reshape(orig_shape)


if __name__ == "__main__":
    key = jax.random.PRNGKey(0)
    # Small NCHW input consistent with the module's generic elementwise forward.
    x = jax.random.normal(key, (2, 4, 16, 16), dtype=jnp.float32)
    sigma = 0.5

    y = normal_proposal(x, sigma, seed=1234)
    y = jax.block_until_ready(y)

    assert y.shape == x.shape and y.dtype == jnp.float32
    assert bool(jnp.all(jnp.isfinite(y)))
    # Sample should be centered on x with spread ~sigma (loose sanity checks).
    resid = (y - x).ravel()
    assert float(jnp.abs(jnp.mean(resid))) < 0.2
    assert 0.2 < float(jnp.std(resid)) < 1.0
    # Different seeds must give different proposals.
    y2 = jax.block_until_ready(normal_proposal(x, sigma, seed=4321))
    assert float(jnp.max(jnp.abs(y2 - y))) > 1e-3

    print("KERNEL_OK")
</pallas_src>

<mosaic_0001>
module attributes {stable_mosaic.version = 11 : i64} {
  func.func @_normal_proposal_kernel(%arg0: i32, %arg1: memref<1xi32, #tpu.memory_space<smem>>, %arg2: memref<1xf32, #tpu.memory_space<smem>>, %arg3: memref<8x1024xf32, #tpu.memory_space<vmem>>, %arg4: memref<8x1024xf32, #tpu.memory_space<vmem>>) attributes {dimension_semantics = [#tpu.dimension_semantics<parallel>], iteration_bounds = array<i64: 1>, scalar_prefetch = 0 : i64, scratch_operands = 0 : i64, tpu.core_type = #tpu.core_type<tc>, window_params = [{transform_indices = @transform_0, window_bounds = array<i64: 1>}, {transform_indices = @transform_1, window_bounds = array<i64: 1>}, {transform_indices = @transform_2, window_bounds = array<i64: 8, 1024>}, {transform_indices = @transform_3, window_bounds = array<i64: 8, 1024>}]} {
    %0 = tpu.iota {dimensions = array<i32: 0>} : vector<8x1024xi32>
    %1 = tpu.iota {dimensions = array<i32: 1>} : vector<8x1024xi32>
    %c8_i32 = arith.constant 8 : i32
    %2 = arith.muli %arg0, %c8_i32 : i32
    %3 = vector.broadcast %2 : i32 to vector<8x1024xi32>
    %4 = arith.addi %3, %0 : vector<8x1024xi32>
    %c1024_i32 = arith.constant 1024 : i32
    %5 = vector.broadcast %c1024_i32 : i32 to vector<8x1024xi32>
    %6 = arith.muli %4, %5 : vector<8x1024xi32>
    %7 = arith.addi %6, %1 : vector<8x1024xi32>
    %c0 = arith.constant 0 : index
    %8 = memref.load %arg1[%c0] : memref<1xi32, #tpu.memory_space<smem>>
    %c-1640531527_i32 = arith.constant -1640531527 : i32
    %9 = arith.muli %8, %c-1640531527_i32 : i32
    %10 = vector.broadcast %9 : i32 to vector<8x1024xi32>
    %11 = arith.xori %7, %10 : vector<8x1024xi32>
    %c16_i32 = arith.constant 16 : i32
    %12 = vector.broadcast %c16_i32 : i32 to vector<8x1024xi32>
    %13 = arith.shrui %11, %12 : vector<8x1024xi32>
    %14 = arith.xori %11, %13 : vector<8x1024xi32>
    %c2146121005_i32 = arith.constant 2146121005 : i32
    %15 = vector.broadcast %c2146121005_i32 : i32 to vector<8x1024xi32>
    %16 = arith.muli %14, %15 : vector<8x1024xi32>
    %c15_i32 = arith.constant 15 : i32
    %17 = vector.broadcast %c15_i32 : i32 to vector<8x1024xi32>
    %18 = arith.shrui %16, %17 : vector<8x1024xi32>
    %19 = arith.xori %16, %18 : vector<8x1024xi32>
    %c-2073254261_i32 = arith.constant -2073254261 : i32
    %20 = vector.broadcast %c-2073254261_i32 : i32 to vector<8x1024xi32>
    %21 = arith.muli %19, %20 : vector<8x1024xi32>
    %c16_i32_0 = arith.constant 16 : i32
    %22 = vector.broadcast %c16_i32_0 : i32 to vector<8x1024xi32>
    %23 = arith.shrui %21, %22 : vector<8x1024xi32>
    %24 = arith.xori %21, %23 : vector<8x1024xi32>
    %c16_i32_1 = arith.constant 16 : i32
    %25 = vector.broadcast %c16_i32_1 : i32 to vector<8x1024xi32>
    %26 = arith.shrui %24, %25 : vector<8x1024xi32>
    %27 = arith.xori %24, %26 : vector<8x1024xi32>
    %c2146121005_i32_2 = arith.constant 2146121005 : i32
    %28 = vector.broadcast %c2146121005_i32_2 : i32 to vector<8x1024xi32>
    %29 = arith.muli %27, %28 : vector<8x1024xi32>
    %c15_i32_3 = arith.constant 15 : i32
    %30 = vector.broadcast %c15_i32_3 : i32 to vector<8x1024xi32>
    %31 = arith.shrui %29, %30 : vector<8x1024xi32>
    %32 = arith.xori %29, %31 : vector<8x1024xi32>
    %c-2073254261_i32_4 = arith.constant -2073254261 : i32
    %33 = vector.broadcast %c-2073254261_i32_4 : i32 to vector<8x1024xi32>
    %34 = arith.muli %32, %33 : vector<8x1024xi32>
    %c16_i32_5 = arith.constant 16 : i32
    %35 = vector.broadcast %c16_i32_5 : i32 to vector<8x1024xi32>
    %36 = arith.shrui %34, %35 : vector<8x1024xi32>
    %37 = arith.xori %34, %36 : vector<8x1024xi32>
    %c8_i32_6 = arith.constant 8 : i32
    %38 = vector.broadcast %c8_i32_6 : i32 to vector<8x1024xi32>
    %39 = arith.shrui %37, %38 : vector<8x1024xi32>
    %40 = arith.sitofp %39 : vector<8x1024xi32> to vector<8x1024xf32>
    %cst = arith.constant 5.000000e-01 : f32
    %41 = vector.broadcast %cst : f32 to vector<8x1024xf32>
    %42 = arith.addf %40, %41 : vector<8x1024xf32>
    %cst_7 = arith.constant 5.96046448E-8 : f32
    %43 = vector.broadcast %cst_7 : f32 to vector<8x1024xf32>
    %44 = arith.mulf %42, %43 : vector<8x1024xf32>
    %cst_8 = arith.constant 5.000000e-01 : f32
    %45 = vector.broadcast %cst_8 : f32 to vector<8x1024xf32>
    %46 = arith.subf %44, %45 : vector<8x1024xf32>
    %47 = arith.mulf %46, %46 : vector<8x1024xf32>
    %cst_9 = arith.constant -39.6968307 : f32
    %48 = vector.broadcast %cst_9 : f32 to vector<8x1024xf32>
    %49 = arith.mulf %48, %47 : vector<8x1024xf32>
    %cst_10 = arith.constant 220.946106 : f32
    %50 = vector.broadcast %cst_10 : f32 to vector<8x1024xf32>
    %51 = arith.addf %49, %50 : vector<8x1024xf32>
    %52 = arith.mulf %51, %47 : vector<8x1024xf32>
    %cst_11 = arith.constant -275.928497 : f32
    %53 = vector.broadcast %cst_11 : f32 to vector<8x1024xf32>
    %54 = arith.addf %52, %53 : vector<8x1024xf32>
    %55 = arith.mulf %54, %47 : vector<8x1024xf32>
    %cst_12 = arith.constant 138.357758 : f32
    %56 = vector.broadcast %cst_12 : f32 to vector<8x1024xf32>
    %57 = arith.addf %55, %56 : vector<8x1024xf32>
    %58 = arith.mulf %57, %47 : vector<8x1024xf32>
    %cst_13 = arith.constant -30.6647987 : f32
    %59 = vector.broadcast %cst_13 : f32 to vector<8x1024xf32>
    %60 = arith.addf %58, %59 : vector<8x1024xf32>
    %61 = arith.mulf %60, %47 : vector<8x1024xf32>
    %cst_14 = arith.constant 2.50662827 : f32
    %62 = vector.broadcast %cst_14 : f32 to vector<8x1024xf32>
    %63 = arith.addf %61, %62 : vector<8x1024xf32>
    %64 = arith.mulf %63, %46 : vector<8x1024xf32>
    %cst_15 = arith.constant -54.4760971 : f32
    %65 = vector.broadcast %cst_15 : f32 to vector<8x1024xf32>
    %66 = arith.mulf %65, %47 : vector<8x1024xf32>
    %cst_16 = arith.constant 161.585831 : f32
    %67 = vector.broadcast %cst_16 : f32 to vector<8x1024xf32>
    %68 = arith.addf %66, %67 : vector<8x1024xf32>
    %69 = arith.mulf %68, %47 : vector<8x1024xf32>
    %cst_17 = arith.constant -155.698975 : f32
    %70 = vector.broadcast %cst_17 : f32 to vector<8x1024xf32>
    %71 = arith.addf %69, %70 : vector<8x1024xf32>
    %72 = arith.mulf %71, %47 : vector<8x1024xf32>
    %cst_18 = arith.constant 66.8013153 : f32
    %73 = vector.broadcast %cst_18 : f32 to vector<8x1024xf32>
    %74 = arith.addf %72, %73 : vector<8x1024xf32>
    %75 = arith.mulf %74, %47 : vector<8x1024xf32>
    %cst_19 = arith.constant -13.2806816 : f32
    %76 = vector.broadcast %cst_19 : f32 to vector<8x1024xf32>
    %77 = arith.addf %75, %76 : vector<8x1024xf32>
    %78 = arith.mulf %77, %47 : vector<8x1024xf32>
    %cst_20 = arith.constant 1.000000e+00 : f32
    %79 = vector.broadcast %cst_20 : f32 to vector<8x1024xf32>
    %80 = arith.addf %78, %79 : vector<8x1024xf32>
    %81 = arith.divf %64, %80 : vector<8x1024xf32>
    %cst_21 = arith.constant 1.000000e+00 : f32
    %82 = vector.broadcast %cst_21 : f32 to vector<8x1024xf32>
    %83 = arith.subf %82, %44 : vector<8x1024xf32>
    %84 = arith.minimumf %44, %83 : vector<8x1024xf32>
    %85 = math.log %84 : vector<8x1024xf32>
    %cst_22 = arith.constant -2.000000e+00 : f32
    %86 = vector.broadcast %cst_22 : f32 to vector<8x1024xf32>
    %87 = arith.mulf %86, %85 : vector<8x1024xf32>
    %88 = math.sqrt %87 : vector<8x1024xf32>
    %cst_23 = arith.constant -0.0077848942 : f32
    %89 = vector.broadcast %cst_23 : f32 to vector<8x1024xf32>
    %90 = arith.mulf %89, %88 : vector<8x1024xf32>
    %cst_24 = arith.constant -0.322396457 : f32
    %91 = vector.broadcast %cst_24 : f32 to vector<8x1024xf32>
    %92 = arith.addf %90, %91 : vector<8x1024xf32>
    %93 = arith.mulf %92, %88 : vector<8x1024xf32>
    %cst_25 = arith.constant -2.40075827 : f32
    %94 = vector.broadcast %cst_25 : f32 to vector<8x1024xf32>
    %95 = arith.addf %93, %94 : vector<8x1024xf32>
    %96 = arith.mulf %95, %88 : vector<8x1024xf32>
    %cst_26 = arith.constant -2.54973245 : f32
    %97 = vector.broadcast %cst_26 : f32 to vector<8x1024xf32>
    %98 = arith.addf %96, %97 : vector<8x1024xf32>
    %99 = arith.mulf %98, %88 : vector<8x1024xf32>
    %cst_27 = arith.constant 4.37466431 : f32
    %100 = vector.broadcast %cst_27 : f32 to vector<8x1024xf32>
    %101 = arith.addf %99, %100 : vector<8x1024xf32>
    %102 = arith.mulf %101, %88 : vector<8x1024xf32>
    %cst_28 = arith.constant 2.938164 : f32
    %103 = vector.broadcast %cst_28 : f32 to vector<8x1024xf32>
    %104 = arith.addf %102, %103 : vector<8x1024xf32>
    %cst_29 = arith.constant 0.00778469583 : f32
    %105 = vector.broadcast %cst_29 : f32 to vector<8x1024xf32>
    %106 = arith.mulf %105, %88 : vector<8x1024xf32>
    %cst_30 = arith.constant 0.322467119 : f32
    %107 = vector.broadcast %cst_30 : f32 to vector<8x1024xf32>
    %108 = arith.addf %106, %107 : vector<8x1024xf32>
    %109 = arith.mulf %108, %88 : vector<8x1024xf32>
    %cst_31 = arith.constant 2.44513416 : f32
    %110 = vector.broadcast %cst_31 : f32 to vector<8x1024xf32>
    %111 = arith.addf %109, %110 : vector<8x1024xf32>
    %112 = arith.mulf %111, %88 : vector<8x1024xf32>
    %cst_32 = arith.constant 3.7544086 : f32
    %113 = vector.broadcast %cst_32 : f32 to vector<8x1024xf32>
    %114 = arith.addf %112, %113 : vector<8x1024xf32>
    %115 = arith.mulf %114, %88 : vector<8x1024xf32>
    %cst_33 = arith.constant 1.000000e+00 : f32
    %116 = vector.broadcast %cst_33 : f32 to vector<8x1024xf32>
    %117 = arith.addf %115, %116 : vector<8x1024xf32>
    %118 = arith.divf %104, %117 : vector<8x1024xf32>
    %cst_34 = arith.constant 5.000000e-01 : f32
    %119 = vector.broadcast %cst_34 : f32 to vector<8x1024xf32>
    %120 = arith.cmpf ogt, %44, %119 : vector<8x1024xf32>
    %cst_35 = arith.constant 0.000000e+00 : f32
    %121 = vector.broadcast %cst_35 : f32 to vector<8x1024xf32>
    %122 = arith.subf %121, %118 : vector<8x1024xf32>
    %123 = arith.select %120, %122, %118 : vector<8x1024xi1>, vector<8x1024xf32>
    %cst_36 = arith.constant 2.425000e-02 : f32
    %124 = vector.broadcast %cst_36 : f32 to vector<8x1024xf32>
    %125 = arith.cmpf olt, %84, %124 : vector<8x1024xf32>
    %126 = arith.select %125, %123, %81 : vector<8x1024xi1>, vector<8x1024xf32>
    %c0_37 = arith.constant 0 : index
    %c0_38 = arith.constant 0 : index
    %127 = vector.load %arg3[%c0_37, %c0_38] : memref<8x1024xf32, #tpu.memory_space<vmem>>, vector<8x1024xf32>
    %c0_39 = arith.constant 0 : index
    %128 = memref.load %arg2[%c0_39] : memref<1xf32, #tpu.memory_space<smem>>
    %129 = vector.broadcast %128 : f32 to vector<8x1024xf32>
    %130 = arith.mulf %129, %126 : vector<8x1024xf32>
    %131 = arith.addf %127, %130 : vector<8x1024xf32>
    %c0_40 = arith.constant 0 : index
    %c0_41 = arith.constant 0 : index
    %132 = vector.load %arg4[%c0_40, %c0_41] : memref<8x1024xf32, #tpu.memory_space<vmem>>, vector<8x1024xf32>
    tpu.vector_store %arg4[%c0_40, %c0_41], %131 {strides = array<i32>} : memref<8x1024xf32, #tpu.memory_space<vmem>>, vector<8x1024xf32>,
    return
  }
  func.func @transform_0(%arg0: i32) -> i32 {
    %c0_i32 = arith.constant 0 : i32
    %c0_i32_0 = arith.constant 0 : i32
    return %c0_i32 : i32
  }
  func.func @transform_1(%arg0: i32) -> i32 {
    %c0_i32 = arith.constant 0 : i32
    %c0_i32_0 = arith.constant 0 : i32
    return %c0_i32 : i32
  }
  func.func @transform_2(%arg0: i32) -> (i32, i32) {
    %c0_i32 = arith.constant 0 : i32
    %c0_i32_0 = arith.constant 0 : i32
    return %arg0, %c0_i32 : i32, i32
  }
  func.func @transform_3(%arg0: i32) -> (i32, i32) {
    %c0_i32 = arith.constant 0 : i32
    %c0_i32_0 = arith.constant 0 : i32
    return %arg0, %c0_i32 : i32, i32
  }
}

</mosaic_0001>

<bundles_post_ra>
// kernel: tpu_custom_call.1
= control target key start
LH: loop header
LB: loop body
LE: loop exit
PB: predicated region body
PF: predicated region fallthrough
CT: control target
= control target key end

     0   :  { %10 = vsyncpa [#allocation5], 0  ;;  %s1474_s0 = inlined_call_operand.<no memory space> [shape: s32[1], index: 0, kind: input, shape index: {}]   ;;  %s1475_s1 = inlined_call_operand.<no memory space> [shape: f32[1], index: 1, kind: input, shape index: {}]   ;;  %s1476_s2 = inlined_call_operand.hbm [shape: f32[8,1024], index: 2, kind: input, shape index: {}]   ;;  %s1477_s3 = inlined_call_operand.hbm [shape: f32[8,1024], index: 3, kind: output, shape index: {}]  }
   0x1   :  { %11 = vsyncpa [#allocation6], 0  ;;  %s890_s12 = smov [#allocation4]   ;;  %s842_s16 = scalar_lea.hbm %s1476_s2, 1024 }
   0x2   :  { %s22_s13 = sshll.u32 %s890_s12, 4  ;;  %p843_p0 = scmp.ne.s32.totalorder %s1476_s2, %s842_s16  ;;  %s23_s13 = int_to_ptr.vmem [resolvable:$true] %s22_s13 }
   0x3   :  { %p846_p1 = scmp.lt.u32.totalorder %s842_s16, %s1476_s2 }
   0x5   :  { %p848_p2 = pnand %p846_p1, %p843_p0 }
   0x7   :  { %851 = shalt.err (!%p848_p2)
}
   0x8   :  { %s852_s21 = scalar_lea.vmem %s23_s13, 1024  ;;  %p857_p4 = scmp.lt.s32.totalorder %s23_s13, %s23_s13 }
   0x9   :  { %p853_p3 = scmp.ne.s32.totalorder %s23_s13, %s852_s21  ;;  %p858_p5 = scmp.lt.s32.totalorder %s852_s21, %s852_s21 }
   0xb   :  { %p859_p6 = por %p858_p5, %p857_p4 }
   0xd   :  { %p860_p7 = pnand %p859_p6, %p853_p3 }
   0xf   :  { %863 = shalt.err (!%p860_p7)
}
  0x10   :  { %25 = dma.hbm_to_vmem [thread:$0]  %s1476_s2, 1024, %s23_s13, [#allocation5]  }
  0x11   :  { %886 = dma.done.wait [#allocation5], 1024  }
  0x12   :  { %887 = vsyncadd [#allocation5], 4294966272  ;;  %v29_v0 = vlaneseq  ;;  %s53_s26 = smul.u32 2654435769, %s1474_s0 }
  0x14   :  { %v30_v1 = vshrl.u32 %v29_v0, 7  ;;  %v32_v2 = vand.u32 127, %v29_v0  ;;  %v54_v11 = vstv %s53_s26 }
  0x16   :  { %v33_v3 = vadd.s32 128, %v32_v2  ;;  %v34_v4 = vadd.s32 256, %v32_v2  ;;  %v35_v5 = vadd.s32 384, %v32_v2  ;;  %v36_v6 = vadd.s32 512, %v32_v2 }
  0x17   :  { %v37_v7 = vadd.s32 640, %v32_v2  ;;  %v38_v8 = vadd.s32 768, %v32_v2  ;;  %v39_v9 = vadd.s32 896, %v32_v2  ;;  %v43_v10 = vmul.u32 1024, %v30_v1 }
  0x19   :  { %v44_v12 = vadd.s32 %v43_v10, %v32_v2  ;;  %v45_v13 = vadd.s32 %v43_v10, %v33_v3  ;;  %v46_v14 = vadd.s32 %v43_v10, %v34_v4  ;;  %v47_v15 = vadd.s32 %v43_v10, %v35_v5 }
  0x1a   :  { %v48_v16 = vadd.s32 %v43_v10, %v36_v6  ;;  %v49_v17 = vadd.s32 %v43_v10, %v37_v7  ;;  %v50_v18 = vadd.s32 %v43_v10, %v38_v8  ;;  %v51_v19 = vadd.s32 %v43_v10, %v39_v9 }
  0x1b   :  { %v55_v20 = vxor.u32 %v54_v11, %v44_v12  ;;  %v56_v21 = vxor.u32 %v54_v11, %v45_v13  ;;  %v57_v22 = vxor.u32 %v54_v11, %v46_v14  ;;  %v58_v23 = vxor.u32 %v54_v11, %v47_v15 }
  0x1c   :  { %v59_v24 = vxor.u32 %v54_v11, %v48_v16  ;;  %v60_v25 = vxor.u32 %v54_v11, %v49_v17  ;;  %v61_v26 = vxor.u32 %v54_v11, %v50_v18  ;;  %v62_v27 = vxor.u32 %v54_v11, %v51_v19 }
  0x1d   :  { %v63_v28 = vshrl.u32 %v55_v20, 16  ;;  %v64_v29 = vshrl.u32 %v56_v21, 16  ;;  %v65_v30 = vshrl.u32 %v57_v22, 16  ;;  %v66_v31 = vshrl.u32 %v58_v23, 16 }
  0x1e   :  { %v67_v32 = vshrl.u32 %v59_v24, 16  ;;  %v68_v33 = vshrl.u32 %v60_v25, 16  ;;  %v69_v34 = vshrl.u32 %v61_v26, 16  ;;  %v70_v35 = vshrl.u32 %v62_v27, 16 }
  0x1f   :  { %v71_v36 = vxor.u32 %v63_v28, %v55_v20  ;;  %v72_v37 = vxor.u32 %v64_v29, %v56_v21  ;;  %v73_v38 = vxor.u32 %v65_v30, %v57_v22  ;;  %v74_v39 = vxor.u32 %v66_v31, %v58_v23 }
  0x20   :  { %v75_v40 = vxor.u32 %v67_v32, %v59_v24  ;;  %v76_v41 = vxor.u32 %v68_v33, %v60_v25  ;;  %v77_v42 = vxor.u32 %v69_v34, %v61_v26  ;;  %v78_v43 = vxor.u32 %v70_v35, %v62_v27 }
  0x21   :  { %v79_v44 = vmul.u32 2146121005, %v71_v36  ;;  %v80_v45 = vmul.u32 2146121005, %v72_v37 }
  0x22   :  { %v81_v46 = vmul.u32 2146121005, %v73_v38  ;;  %v82_v47 = vmul.u32 2146121005, %v74_v39 }
  0x23   :  { %v83_v48 = vmul.u32 2146121005, %v75_v40  ;;  %v84_v49 = vmul.u32 2146121005, %v76_v41  ;;  %v87_v50 = vshrl.u32 %v79_v44, 15  ;;  %v88_v51 = vshrl.u32 %v80_v45, 15 }
  0x24   :  { %v85_v52 = vmul.u32 2146121005, %v77_v42  ;;  %v86_v53 = vmul.u32 2146121005, %v78_v43  ;;  %v89_v54 = vshrl.u32 %v81_v46, 15  ;;  %v90_v55 = vshrl.u32 %v82_v47, 15 }
  0x25   :  { %v91_v56 = vshrl.u32 %v83_v48, 15  ;;  %v92_v57 = vshrl.u32 %v84_v49, 15  ;;  %v95_v58 = vxor.u32 %v87_v50, %v79_v44  ;;  %v96_v59 = vxor.u32 %v88_v51, %v80_v45 }
  0x26   :  { %v93_v60 = vshrl.u32 %v85_v52, 15  ;;  %v94_v61 = vshrl.u32 %v86_v53, 15  ;;  %v97_v62 = vxor.u32 %v89_v54, %v81_v46  ;;  %v98_v63 = vxor.u32 %v90_v55, %v82_v47 }
  0x27   :  { %v99_v0 = vxor.u32 %v91_v56, %v83_v48  ;;  %v100_v1 = vxor.u32 %v92_v57, %v84_v49  ;;  %v103_v2 = vmul.u32 2221713035, %v95_v58  ;;  %v104_v3 = vmul.u32 2221713035, %v96_v59 }
  0x28   :  { %v101_v4 = vxor.u32 %v93_v60, %v85_v52  ;;  %v102_v5 = vxor.u32 %v94_v61, %v86_v53  ;;  %v105_v6 = vmul.u32 2221713035, %v97_v62  ;;  %v106_v7 = vmul.u32 2221713035, %v98_v63 }
  0x29   :  { %v107_v8 = vmul.u32 2221713035, %v99_v0  ;;  %v108_v9 = vmul.u32 2221713035, %v100_v1  ;;  %v111_v10 = vshrl.u32 %v103_v2, 16  ;;  %v112_v11 = vshrl.u32 %v104_v3, 16 }
  0x2a   :  { %v109_v12 = vmul.u32 2221713035, %v101_v4  ;;  %v110_v13 = vmul.u32 2221713035, %v102_v5  ;;  %v113_v14 = vshrl.u32 %v105_v6, 16  ;;  %v114_v15 = vshrl.u32 %v106_v7, 16 }
  0x2b   :  { %v115_v16 = vshrl.u32 %v107_v8, 16  ;;  %v116_v17 = vshrl.u32 %v108_v9, 16  ;;  %v119_v18 = vxor.u32 %v111_v10, %v103_v2  ;;  %v120_v19 = vxor.u32 %v112_v11, %v104_v3 }
  0x2c   :  { %v117_v20 = vshrl.u32 %v109_v12, 16  ;;  %v118_v21 = vshrl.u32 %v110_v13, 16  ;;  %v121_v22 = vxor.u32 %v113_v14, %v105_v6  ;;  %v122_v23 = vxor.u32 %v114_v15, %v106_v7 }
  0x2d   :  { %v123_v24 = vxor.u32 %v115_v16, %v107_v8  ;;  %v124_v25 = vxor.u32 %v116_v17, %v108_v9  ;;  %v127_v26 = vshrl.u32 %v119_v18, 16  ;;  %v128_v27 = vshrl.u32 %v120_v19, 16 }
  0x2e   :  { %v125_v28 = vxor.u32 %v117_v20, %v109_v12  ;;  %v126_v29 = vxor.u32 %v118_v21, %v110_v13  ;;  %v129_v30 = vshrl.u32 %v121_v22, 16  ;;  %v130_v31 = vshrl.u32 %v122_v23, 16 }
  0x2f   :  { %v131_v32 = vshrl.u32 %v123_v24, 16  ;;  %v132_v33 = vshrl.u32 %v124_v25, 16  ;;  %v135_v34 = vxor.u32 %v127_v26, %v119_v18  ;;  %v136_v35 = vxor.u32 %v128_v27, %v120_v19 }
  0x30   :  { %v133_v36 = vshrl.u32 %v125_v28, 16  ;;  %v134_v37 = vshrl.u32 %v126_v29, 16  ;;  %v137_v38 = vxor.u32 %v129_v30, %v121_v22  ;;  %v138_v39 = vxor.u32 %v130_v31, %v122_v23 }
  0x31   :  { %v139_v40 = vxor.u32 %v131_v32, %v123_v24  ;;  %v140_v41 = vxor.u32 %v132_v33, %v124_v25  ;;  %v143_v42 = vmul.u32 2146121005, %v135_v34  ;;  %v144_v43 = vmul.u32 2146121005, %v136_v35 }
  0x32   :  { %v141_v44 = vxor.u32 %v133_v36, %v125_v28  ;;  %v142_v45 = vxor.u32 %v134_v37, %v126_v29  ;;  %v145_v46 = vmul.u32 2146121005, %v137_v38  ;;  %v146_v47 = vmul.u32 2146121005, %v138_v39 }
  0x33   :  { %v147_v48 = vmul.u32 2146121005, %v139_v40  ;;  %v148_v49 = vmul.u32 2146121005, %v140_v41  ;;  %v151_v50 = vshrl.u32 %v143_v42, 15  ;;  %v152_v51 = vshrl.u32 %v144_v43, 15 }
  0x34   :  { %v149_v52 = vmul.u32 2146121005, %v141_v44  ;;  %v150_v53 = vmul.u32 2146121005, %v142_v45  ;;  %v153_v54 = vshrl.u32 %v145_v46, 15  ;;  %v154_v55 = vshrl.u32 %v146_v47, 15 }
  0x35   :  { %v155_v56 = vshrl.u32 %v147_v48, 15  ;;  %v156_v57 = vshrl.u32 %v148_v49, 15  ;;  %v159_v58 = vxor.u32 %v151_v50, %v143_v42  ;;  %v160_v59 = vxor.u32 %v152_v51, %v144_v43 }
  0x36   :  { %v157_v60 = vshrl.u32 %v149_v52, 15  ;;  %v158_v61 = vshrl.u32 %v150_v53, 15  ;;  %v161_v62 = vxor.u32 %v153_v54, %v145_v46  ;;  %v162_v63 = vxor.u32 %v154_v55, %v146_v47 }
  0x37   :  { %v163_v0 = vxor.u32 %v155_v56, %v147_v48  ;;  %v164_v1 = vxor.u32 %v156_v57, %v148_v49  ;;  %v167_v2 = vmul.u32 2221713035, %v159_v58  ;;  %v168_v3 = vmul.u32 2221713035, %v160_v59 }
  0x38   :  { %v165_v4 = vxor.u32 %v157_v60, %v149_v52  ;;  %v166_v5 = vxor.u32 %v158_v61, %v150_v53  ;;  %v169_v6 = vmul.u32 2221713035, %v161_v62  ;;  %v170_v7 = vmul.u32 2221713035, %v162_v63 }
  0x39   :  { %v171_v8 = vmul.u32 2221713035, %v163_v0  ;;  %v172_v9 = vmul.u32 2221713035, %v164_v1  ;;  %v175_v10 = vshrl.u32 %v167_v2, 16  ;;  %v176_v11 = vshrl.u32 %v168_v3, 16 }
  0x3a   :  { %v173_v12 = vmul.u32 2221713035, %v165_v4  ;;  %v174_v13 = vmul.u32 2221713035, %v166_v5  ;;  %v177_v14 = vshrl.u32 %v169_v6, 16  ;;  %v178_v15 = vshrl.u32 %v170_v7, 16 }
  0x3b   :  { %v179_v16 = vshrl.u32 %v171_v8, 16  ;;  %v180_v17 = vshrl.u32 %v172_v9, 16  ;;  %v183_v18 = vxor.u32 %v175_v10, %v167_v2  ;;  %v184_v21 = vxor.u32 %v176_v11, %v168_v3 }
  0x3c   :  { %v181_v19 = vshrl.u32 %v173_v12, 16  ;;  %v182_v20 = vshrl.u32 %v174_v13, 16  ;;  %v185_v22 = vxor.u32 %v177_v14, %v169_v6  ;;  %v186_v23 = vxor.u32 %v178_v15, %v170_v7 }
  0x3d   :  { %v187_v24 = vxor.u32 %v179_v16, %v171_v8  ;;  %v191_v25 = vshrl.u32 %v183_v18, 8  ;;  %v188_v26 = vxor.u32 %v180_v17, %v172_v9  ;;  %v192_v29 = vshrl.u32 %v184_v21, 8 }
  0x3e   :  { %v189_v27 = vxor.u32 %v181_v19, %v173_v12  ;;  %v190_v28 = vxor.u32 %v182_v20, %v174_v13  ;;  %v193_v30 = vshrl.u32 %v185_v22, 8  ;;  %v194_v31 = vshrl.u32 %v186_v23, 8 }
  0x3f   :  { %v195_v32 = vshrl.u32 %v187_v24, 8  ;;  %v199_v33 = vcvt.s32.f32 %v191_v25  ;;  %v196_v34 = vshrl.u32 %v188_v26, 8  ;;  %v200_v37 = vcvt.s32.f32 %v192_v29 }
  0x40   :  { %v197_v35 = vshrl.u32 %v189_v27, 8  ;;  %v198_v36 = vshrl.u32 %v190_v28, 8  ;;  %v201_v38 = vcvt.s32.f32 %v193_v30  ;;  %v202_v39 = vcvt.s32.f32 %v194_v31 }
  0x41   :  { %v203_v40 = vcvt.s32.f32 %v195_v32  ;;  %v207_v41 = vadd.f32 0.5, %v199_v33  ;;  %v204_v42 = vcvt.s32.f32 %v196_v34  ;;  %v208_v45 = vadd.f32 0.5, %v200_v37 }
  0x42   :  { %v205_v43 = vcvt.s32.f32 %v197_v35  ;;  %v206_v44 = vcvt.s32.f32 %v198_v36  ;;  %v209_v46 = vadd.f32 0.5, %v201_v38  ;;  %v210_v47 = vadd.f32 0.5, %v202_v39 }
  0x43   :  { %v211_v48 = vadd.f32 0.5, %v203_v40  ;;  %v927_v49 = vmul.f32 5.9604645e-08, %v207_v41  ;;  %v212_v50 = vadd.f32 0.5, %v204_v42  ;;  %v929_v53 = vmul.f32 5.9604645e-08, %v208_v45 }
  0x44   :  { %v213_v51 = vadd.f32 0.5, %v205_v43  ;;  %v214_v52 = vadd.f32 0.5, %v206_v44  ;;  %v931_v54 = vmul.f32 5.9604645e-08, %v209_v46  ;;  %v936_v56 = vmul.f32 5.9604645e-08, %v210_v47 }
  0x45   :  { %v934_v55 = vadd.f32 -0.5, %v927_v49  ;;  %v938_v57 = vmul.f32 5.9604645e-08, %v211_v48  ;;  %v941_v58 = vadd.f32 -0.5, %v929_v53  ;;  %v946_v60 = vmul.f32 5.9604645e-08, %v212_v50 }
  0x46   :  { %v944_v59 = vadd.f32 -0.5, %v931_v54  ;;  %v948_v61 = vmul.f32 5.9604645e-08, %v213_v51  ;;  %v951_v62 = vadd.f32 -0.5, %v936_v56  ;;  %v956_v0 = vmul.f32 5.9604645e-08, %v214_v52 }
  0x47   :  { %v954_v63 = vadd.f32 -0.5, %v938_v57  ;;  %v960_v1 = vmul.f32 %v934_v55, %v934_v55  ;;  %v963_v2 = vadd.f32 -0.5, %v946_v60  ;;  %v973_v5 = vmul.f32 %v941_v58, %v941_v58 }
  0x48   :  { %v966_v3 = vadd.f32 -0.5, %v948_v61  ;;  %v969_v4 = vadd.f32 -0.5, %v956_v0  ;;  %v977_v6 = vmul.f32 %v944_v59, %v944_v59  ;;  %v982_v8 = vmul.f32 %v951_v62, %v951_v62 }
  0x49   :  { %v239_v7 = vmul.f32 -39.69683, %v960_v1  ;;  %v986_v9 = vmul.f32 %v954_v63, %v954_v63  ;;  %v240_v10 = vmul.f32 -39.69683, %v973_v5  ;;  %v992_v12 = vmul.f32 %v963_v2, %v963_v2 }
  0x4a   :  { %v241_v11 = vmul.f32 -39.69683, %v977_v6  ;;  %v996_v13 = vmul.f32 %v966_v3, %v966_v3  ;;  %v242_v14 = vmul.f32 -39.69683, %v982_v8  ;;  %v1002_v16 = vmul.f32 %v969_v4, %v969_v4 }
  0x4b   :  { %v243_v15 = vmul.f32 -39.69683, %v986_v9  ;;  %v247_v17 = vadd.f32 220.9461, %v239_v7  ;;  %v244_v18 = vmul.f32 -39.69683, %v992_v12 }
  0x4c   :  { %v245_v19 = vmul.f32 -39.69683, %v996_v13  ;;  %v246_v20 = vmul.f32 -39.69683, %v1002_v16  ;;  %v248_v21 = vadd.f32 220.9461, %v240_v10 }
  0x4d   :  { %v249_v22 = vadd.f32 220.9461, %v241_v11  ;;  %v250_v23 = vadd.f32 220.9461, %v242_v14  ;;  %v251_v24 = vadd.f32 220.9461, %v243_v15  ;;  %v255_v25 = vmul.f32 %v247_v17, %v960_v1 }
  0x4e   :  { %v252_v26 = vadd.f32 220.9461, %v244_v18  ;;  %v253_v27 = vadd.f32 220.9461, %v245_v19  ;;  %v254_v28 = vadd.f32 220.9461, %v246_v20  ;;  %v256_v29 = vmul.f32 %v248_v21, %v973_v5 }
  0x4f   :  { %v257_v30 = vmul.f32 %v249_v22, %v977_v6  ;;  %v258_v31 = vmul.f32 %v250_v23, %v982_v8  ;;  %v259_v32 = vmul.f32 %v251_v24, %v986_v9  ;;  %v263_v33 = vadd.f32 -275.9285, %v255_v25 }
  0x50   :  { %v260_v34 = vmul.f32 %v252_v26, %v992_v12  ;;  %v261_v35 = vmul.f32 %v253_v27, %v996_v13  ;;  %v262_v36 = vmul.f32 %v254_v28, %v1002_v16  ;;  %v264_v37 = vadd.f32 -275.9285, %v256_v29 }
  0x51   :  { %v265_v38 = vadd.f32 -275.9285, %v257_v30  ;;  %v266_v39 = vadd.f32 -275.9285, %v258_v31  ;;  %v267_v40 = vadd.f32 -275.9285, %v259_v32  ;;  %v271_v41 = vmul.f32 %v263_v33, %v960_v1 }
  0x52   :  { %v268_v42 = vadd.f32 -275.9285, %v260_v34  ;;  %v269_v43 = vadd.f32 -275.9285, %v261_v35  ;;  %v270_v44 = vadd.f32 -275.9285, %v262_v36  ;;  %v272_v45 = vmul.f32 %v264_v37, %v973_v5 }
  0x53   :  { %v273_v46 = vmul.f32 %v265_v38, %v977_v6  ;;  %v274_v47 = vmul.f32 %v266_v39, %v982_v8  ;;  %v275_v48 = vmul.f32 %v267_v40, %v986_v9  ;;  %v279_v50 = vadd.f32 138.35776, %v271_v41 }
  0x54   :  { %v276_v51 = vmul.f32 %v268_v42, %v992_v12  ;;  %v277_v52 = vmul.f32 %v269_v43, %v996_v13  ;;  %v278_v7 = vmul.f32 %v270_v44, %v1002_v16  ;;  %v280_v10 = vadd.f32 138.35776, %v272_v45 }
  0x55   :  { %v281_v11 = vadd.f32 138.35776, %v273_v46  ;;  %v282_v14 = vadd.f32 138.35776, %v274_v47  ;;  %v283_v15 = vadd.f32 138.35776, %v275_v48  ;;  %v287_v17 = vmul.f32 %v279_v50, %v960_v1 }
  0x56   :  { %v284_v18 = vadd.f32 138.35776, %v276_v51  ;;  %v285_v19 = vadd.f32 138.35776, %v277_v52  ;;  %v286_v20 = vadd.f32 138.35776, %v278_v7  ;;  %v288_v21 = vmul.f32 %v280_v10, %v973_v5 }
  0x57   :  { %v289_v22 = vmul.f32 %v281_v11, %v977_v6  ;;  %v290_v23 = vmul.f32 %v282_v14, %v982_v8  ;;  %v291_v24 = vmul.f32 %v283_v15, %v986_v9  ;;  %v295_v25 = vadd.f32 -30.664799, %v287_v17 }
  0x58   :  { %v292_v26 = vmul.f32 %v284_v18, %v992_v12  ;;  %v293_v27 = vmul.f32 %v285_v19, %v996_v13  ;;  %v294_v28 = vmul.f32 %v286_v20, %v1002_v16  ;;  %v296_v29 = vadd.f32 -30.664799, %v288_v21 }
  0x59   :  { %v297_v30 = vadd.f32 -30.664799, %v289_v22  ;;  %v298_v31 = vadd.f32 -30.664799, %v290_v23  ;;  %v299_v32 = vadd.f32 -30.664799, %v291_v24  ;;  %v303_v33 = vmul.f32 %v295_v25, %v960_v1 }
  0x5a   :  { %v300_v34 = vadd.f32 -30.664799, %v292_v26  ;;  %v301_v35 = vadd.f32 -30.664799, %v293_v27  ;;  %v302_v36 = vadd.f32 -30.664799, %v294_v28  ;;  %v304_v37 = vmul.f32 %v296_v29, %v973_v5 }
  0x5b   :  { %v305_v38 = vmul.f32 %v297_v30, %v977_v6  ;;  %v306_v39 = vmul.f32 %v298_v31, %v982_v8  ;;  %v307_v40 = vmul.f32 %v299_v32, %v986_v9  ;;  %v327_v41 = vmul.f32 -54.476097, %v960_v1 }
  0x5c   :  { %v328_v42 = vmul.f32 -54.476097, %v973_v5  ;;  %v311_v43 = vadd.f32 2.5066283, %v303_v33  ;;  %v329_v44 = vmul.f32 -54.476097, %v977_v6  ;;  %v308_v47 = vmul.f32 %v300_v34, %v992_v12 }
  0x5d   :  { %v423_v45 = vsub.f32 1.0, %v927_v49  ;;  %v424_v46 = vsub.f32 1.0, %v929_v53  ;;  %v309_v48 = vmul.f32 %v301_v35, %v996_v13  ;;  %v330_v50 = vmul.f32 -54.476097, %v982_v8 }
  0x5e   :  { %v425_v51 = vsub.f32 1.0, %v931_v54  ;;  %v310_v52 = vmul.f32 %v302_v36, %v1002_v16  ;;  %v331_v7 = vmul.f32 -54.476097, %v986_v9  ;;  %v332_v10 = vmul.f32 -54.476097, %v992_v12 }
  0x5f   :  { %v426_v11 = vsub.f32 1.0, %v936_v56  ;;  %v335_v14 = vadd.f32 161.58583, %v327_v41  ;;  %v336_v15 = vadd.f32 161.58583, %v328_v42  ;;  %v427_v17 = vsub.f32 1.0, %v938_v57 }
  0x60   :  { %v1051_v18 = vmin.f32 %v927_v49, %v423_v45  ;;  %v333_v19 = vmul.f32 -54.476097, %v996_v13  ;;  %v337_v20 = vadd.f32 161.58583, %v329_v44  ;;  %v428_v21 = vsub.f32 1.0, %v946_v60 }
  0x61   :  { %v1056_v22 = vmin.f32 %v929_v53, %v424_v46  ;;  %v334_v23 = vmul.f32 -54.476097, %v1002_v16  ;;  %v338_v24 = vadd.f32 161.58583, %v330_v50  ;;  %v429_v25 = vsub.f32 1.0, %v948_v61 }
  0x62   :  { %v1061_v26 = vmin.f32 %v931_v54, %v425_v51  ;;  %v339_v27 = vadd.f32 161.58583, %v331_v7  ;;  %v340_v28 = vadd.f32 161.58583, %v332_v10  ;;  %v430_v29 = vsub.f32 1.0, %v956_v0 }
  0x63   :  { %v1065_v30 = vmin.f32 %v936_v56, %v426_v11  ;;  %v343_v31 = vmul.f32 %v335_v14, %v960_v1  ;;  %v344_v32 = vmul.f32 %v336_v15, %v973_v5  ;;  %v1070_v33 = vmin.f32 %v938_v57, %v427_v17 }
  0x64   :  { %778 = vlog2.f32 %v1051_v18  ;;  %v341_v34 = vadd.f32 161.58583, %v333_v19  ;;  %v345_v35 = vmul.f32 %v337_v20, %v977_v6  ;;  %v1075_v36 = vmin.f32 %v946_v60, %v428_v21 }
  0x65   :  { %780 = vlog2.f32 %v1056_v22  ;;  %v342_v41 = vadd.f32 161.58583, %v334_v23  ;;  %v346_v42 = vmul.f32 %v338_v24, %v982_v8  ;;  %v1080_v44 = vmin.f32 %v948_v61, %v429_v25 }
  0x66   :  { %782 = vlog2.f32 %v1061_v26  ;;  %v312_v45 = vadd.f32 2.5066283, %v304_v37  ;;  %v347_v46 = vmul.f32 %v339_v27, %v986_v9  ;;  %v1085_v50 = vmin.f32 %v956_v0, %v430_v29 }
  0x67   :  { %784 = vlog2.f32 %v1065_v30  ;;  %v348_v51 = vmul.f32 %v340_v28, %v992_v12  ;;  %v351_v7 = vadd.f32 -155.69897, %v343_v31  ;;  %v352_v10 = vadd.f32 -155.69897, %v344_v32 }
  0x68   :  { %1481 = vst [vmem:[#allocation10_spill] sm:$0xff] %v1085_v50  ;;  %786 = vlog2.f32 %v1070_v33  ;;  %v313_v11 = vadd.f32 2.5066283, %v305_v38  ;;  %v349_v14 = vmul.f32 %v341_v34, %v996_v13  ;;  %v353_v15 = vadd.f32 -155.69897, %v345_v35 }
  0x69   :  { %788 = vlog2.f32 %v1075_v36  ;;  %v314_v37 = vadd.f32 2.5066283, %v306_v39  ;;  %v350_v17 = vmul.f32 %v342_v41, %v1002_v16  ;;  %v354_v19 = vadd.f32 -155.69897, %v346_v42 }
  0x6a   :  { %790 = vlog2.f32 %v1080_v44  ;;  %v315_v20 = vadd.f32 2.5066283, %v307_v40  ;;  %v1095_v21 = vmul.f32 %v934_v55, %v311_v43  ;;  %v355_v23 = vadd.f32 -155.69897, %v347_v46 }
  0x6b   :  { %792 = vlog2.f32 %v1085_v50  ;;  %v316_v24 = vadd.f32 2.5066283, %v308_v47  ;;  %v356_v38 = vadd.f32 -155.69897, %v348_v51  ;;  %v359_v25 = vmul.f32 %v351_v7, %v960_v1 }
  0x6c   :  { %v360_v27 = vmul.f32 %v352_v10, %v973_v5  ;;  %v317_v28 = vadd.f32 2.5066283, %v309_v48  ;;  %v318_v39 = vadd.f32 2.5066283, %v310_v52  ;;  %v357_v29 = vadd.f32 -155.69897, %v349_v14 }
  0x6d   :  { %v361_v31 = vmul.f32 %v353_v15, %v977_v6  ;;  %v1102_v40 = vmul.f32 %v941_v58, %v312_v45  ;;  %v1105_v55 = vmul.f32 %v944_v59, %v313_v11  ;;  %v358_v43 = vadd.f32 -155.69897, %v350_v17 }
  0x6e   :  { %v779_v32 = vpop.eup %778  ;;  %v362_v47 = vmul.f32 %v354_v19, %v982_v8  ;;  %v1109_v35 = vmul.f32 %v951_v62, %v314_v37  ;;  %v1112_v48 = vmul.f32 %v954_v63, %v315_v20  ;;  %v363_v52 = vmul.f32 %v355_v23, %v986_v9 }
  0x6f   :  { %v781_v34 = vpop.eup %780  ;;  %v440_v41 = vmul.f32 0.6931472, %v779_v32  ;;  %v364_v58 = vmul.f32 %v356_v38, %v992_v12  ;;  %v367_v45 = vadd.f32 66.801315, %v359_v25  ;;  %v368_v46 = vadd.f32 66.801315, %v360_v27 }
  0x70   :  { %v783_v42 = vpop.eup %782  ;;  %v442_v59 = vmul.f32 0.6931472, %v781_v34  ;;  %v365_v7 = vmul.f32 %v357_v29, %v996_v13  ;;  %v369_v10 = vadd.f32 66.801315, %v361_v31  ;;  %v366_v63 = vmul.f32 %v358_v43, %v1002_v16 }
  0x71   :  { %v785_v51 = vpop.eup %784  ;;  %v444_v11 = vmul.f32 0.6931472, %v783_v42  ;;  %v1117_v14 = vmul.f32 -2.0, %v440_v41  ;;  %v370_v15 = vadd.f32 66.801315, %v362_v47  ;;  %v1126_v27 = vmul.f32 %v963_v2, %v316_v24 }
  0x72   :  { %v787_v62 = vpop.eup %786  ;;  %v446_v37 = vmul.f32 0.6931472, %v785_v51  ;;  %v1120_v17 = vmul.f32 -2.0, %v442_v59  ;;  %v371_v20 = vadd.f32 66.801315, %v363_v52  ;;  %v375_v42 = vmul.f32 %v367_v45, %v960_v1 }
  0x73   :  { %v789_v19 = vpop.eup %788  ;;  %v448_v23 = vmul.f32 0.6931472, %v787_v62  ;;  %v1122_v38 = vmul.f32 -2.0, %v444_v11  ;;  %794 = vrsqrt.f32 %v1117_v14  ;;  %1482 = vst [vmem:[#allocation11_spill] sm:$0xff] %v1126_v27  ;;  %v372_v29 = vadd.f32 66.801315, %v364_v58 }
  0x74   :  { %v791_v25 = vpop.eup %790  ;;  %v450_v31 = vmul.f32 0.6931472, %v789_v19  ;;  %v1128_v32 = vmul.f32 -2.0, %v446_v37  ;;  %v373_v47 = vadd.f32 66.801315, %v365_v7  ;;  %796 = vrsqrt.f32 %v1120_v17 }
  0x75   :  { %v793_v43 = vpop.eup %792  ;;  %v452_v34 = vmul.f32 0.6931472, %v791_v25  ;;  %v1130_v41 = vmul.f32 -2.0, %v448_v23  ;;  %v374_v52 = vadd.f32 66.801315, %v366_v63  ;;  %v376_v2 = vmul.f32 %v368_v46, %v973_v5 }
  0x76   :  { %v454_v59 = vmul.f32 0.6931472, %v793_v43  ;;  %v1134_v51 = vmul.f32 -2.0, %v450_v31  ;;  %v377_v24 = vmul.f32 %v369_v10, %v977_v6  ;;  %798 = vrsqrt.f32 %v1122_v38 }
  0x77   :  { %v1138_v58 = vmul.f32 -2.0, %v452_v34  ;;  %v1142_v7 = vmul.f32 %v966_v3, %v317_v28  ;;  %v1145_v11 = vmul.f32 %v969_v4, %v318_v39  ;;  %800 = vrsqrt.f32 %v1128_v32 }
  0x78   :  { %v1147_v62 = vmul.f32 -2.0, %v454_v59  ;;  %v1151_v45 = vmul.f32 %v370_v15, %v982_v8  ;;  %v1154_v46 = vmul.f32 %v371_v20, %v986_v9  ;;  %v1157_v10 = vmul.f32 %v372_v29, %v992_v12 }
  0x79   :  { %1483 = vst [vmem:[#allocation12_spill] sm:$0xff] %v1142_v7  ;;  %1484 = vst [vmem:[#allocation13_spill] sm:$0xff] %v1145_v11  ;;  %802 = vrsqrt.f32 %v1130_v41  ;;  %v1161_v3 = vmul.f32 %v373_v47, %v996_v13  ;;  %v1164_v4 = vmul.f32 %v374_v52, %v1002_v16  ;;  %v1166_v28 = vadd.f32 -13.280682, %v375_v42 }
  0x7a   :  { %804 = vrsqrt.f32 %v1134_v51  ;;  %v1169_v39 = vadd.f32 -13.280682, %v376_v2  ;;  %v1171_v63 = vadd.f32 -13.280682, %v377_v24  ;;  %vm465_vm0 = vcmp.eq.f32.partialorder %v1117_v14, inf }
  0x7b   :  { %806 = vrsqrt.f32 %v1138_v58  ;;  %vm467_vm1 = vcmp.eq.f32.partialorder %v1117_v14, 0.0  ;;  %v468_v15 = vand.u32 2147483648, %v1117_v14  ;;  %vm472_vm2 = vcmp.eq.f32.partialorder %v1120_v17, inf }
  0x7c   :  { %808 = vrsqrt.f32 %v1147_v62  ;;  %vm474_vm3 = vcmp.eq.f32.partialorder %v1120_v17, 0.0  ;;  %v475_v19 = vand.u32 2147483648, %v1120_v17  ;;  %vm479_vm4 = vcmp.eq.f32.partialorder %v1122_v38, inf }
  0x7d   :  { %v795_v37 = vpop.eup %794  ;;  %vm481_vm5 = vcmp.eq.f32.partialorder %v1122_v38, 0.0  ;;  %v482_v23 = vand.u32 2147483648, %v1122_v38  ;;  %vm486_vm6 = vcmp.eq.f32.partialorder %v1128_v32, inf  ;;  %vm488_vm7 = vcmp.eq.f32.partialorder %v1128_v32, 0.0 }
  0x7e   :  { %v464_v20 = vmul.f32 %v795_v37, %v1117_v14  ;;  %v797_v25 = vpop.eup %796  ;;  %v489_v29 = vand.u32 2147483648, %v1128_v32  ;;  %vm493_vm8 = vcmp.eq.f32.partialorder %v1130_v41, inf  ;;  %vm495_vm9 = vcmp.eq.f32.partialorder %v1130_v41, 0.0 }
  0x7f   :  { %v496_v31 = vand.u32 2147483648, %v1130_v41  ;;  %v471_v47 = vmul.f32 %v797_v25, %v1120_v17  ;;  %vm500_vm10 = vcmp.eq.f32.partialorder %v1134_v51, inf  ;;  %vm502_vm11 = vcmp.eq.f32.partialorder %v1134_v51, 0.0 }
  0x80   :  { %v466_v43 = vsel %vm465_vm0, %v1117_v14, %v464_v20  ;;  %v799_v34 = vpop.eup %798  ;;  %v503_v42 = vand.u32 2147483648, %v1134_v51  ;;  %vm507_vm12 = vcmp.eq.f32.partialorder %v1138_v58, inf  ;;  %vm509_vm13 = vcmp.eq.f32.partialorder %v1138_v58, 0.0 }
  0x81   :  { %v1199_v52 = vsel %vm467_vm1, %v468_v15, %v466_v43  ;;  %v801_v59 = vpop.eup %800  ;;  %v473_v2 = vsel %vm472_vm2, %v1120_v17, %v471_v47  ;;  %v478_v24 = vmul.f32 %v799_v34, %v1122_v38  ;;  %v510_v37 = vand.u32 2147483648, %v1138_v58 }
  0x82   :  { %v519_v20 = vmul.f32 -0.007784894, %v1199_v52  ;;  %v1212_v15 = vsel %vm474_vm3, %v475_v19, %v473_v2  ;;  %v485_v25 = vmul.f32 %v801_v59, %v1128_v32  ;;  %vm514_vm14 = vcmp.eq.f32.partialorder %v1147_v62, inf }
  0x83   :  { %v803_v14 = vpop.eup %802  ;;  %vm516_vm15 = vcmp.eq.f32.partialorder %v1147_v62, 0.0  ;;  %v480_v47 = vsel %vm479_vm4, %v1122_v38, %v478_v24  ;;  %v517_v11 = vand.u32 2147483648, %v1147_v62  ;;  %v520_v7 = vmul.f32 -0.007784894, %v1212_v15 }
  0x84   :  { %v805_v43 = vpop.eup %804  ;;  %v492_v34 = vmul.f32 %v803_v14, %v1130_v41  ;;  %v1225_v19 = vsel %vm481_vm5, %v482_v23, %v480_v47  ;;  %v487_v59 = vsel %vm486_vm6, %v1128_v32, %v485_v25  ;;  %v527_v27 = vadd.f32 -0.32239646, %v519_v20 }
  0x85   :  { %v807_v17 = vpop.eup %806  ;;  %v499_v2 = vmul.f32 %v805_v43, %v1134_v51  ;;  %v1233_v24 = vsel %vm488_vm7, %v489_v29, %v487_v59  ;;  %v521_v23 = vmul.f32 -0.007784894, %v1225_v19  ;;  %vm679_vm0 = vcmp.gt.f32.partialorder %v927_v49, 0.5 }
  0x86   :  { %v809_v50 = vpop.eup %808  ;;  %v494_v14 = vsel %vm493_vm8, %v1130_v41, %v492_v34  ;;  %v506_v38 = vmul.f32 %v807_v17, %v1138_v58  ;;  %v522_v29 = vmul.f32 -0.007784894, %v1233_v24  ;;  %vm680_vm1 = vcmp.gt.f32.partialorder %v929_v53, 0.5 }
  0x87   :  { %v1242_v47 = vsel %vm495_vm9, %v496_v31, %v494_v14  ;;  %v501_v20 = vsel %vm500_vm10, %v1134_v51, %v499_v2  ;;  %v513_v32 = vmul.f32 %v809_v50, %v1147_v62  ;;  %v528_v31 = vadd.f32 -0.32239646, %v520_v7 }
  0x88   :  { %v1251_v25 = vsel %vm502_vm11, %v503_v42, %v501_v20  ;;  %v508_v43 = vsel %vm507_vm12, %v1138_v58, %v506_v38  ;;  %v523_v41 = vmul.f32 -0.007784894, %v1242_v47  ;;  %v529_v51 = vadd.f32 -0.32239646, %v521_v23 }
  0x89   :  { %v1259_v34 = vsel %vm509_vm13, %v510_v37, %v508_v43  ;;  %v515_v50 = vsel %vm514_vm14, %v1147_v62, %v513_v32  ;;  %v524_v17 = vmul.f32 -0.007784894, %v1251_v25  ;;  %v530_v2 = vadd.f32 -0.32239646, %v522_v29 }
  0x8a   :  { %v1267_v42 = vsel %vm516_vm15, %v517_v11, %v515_v50  ;;  %v525_v59 = vmul.f32 -0.007784894, %v1259_v34  ;;  %v531_v14 = vadd.f32 -0.32239646, %v523_v41  ;;  %v386_v7 = vadd.f32 -13.280682, %v1151_v45 }
  0x8b   :  { %v526_v58 = vmul.f32 -0.007784894, %v1267_v42  ;;  %v532_v37 = vadd.f32 -0.32239646, %v524_v17  ;;  %v535_v38 = vmul.f32 %v527_v27, %v1199_v52  ;;  %v387_v20 = vadd.f32 -13.280682, %v1154_v46 }
  0x8c   :  { %v391_v23 = vmul.f32 %v1166_v28, %v960_v1  ;;  %v392_v11 = vmul.f32 %v1169_v39, %v973_v5  ;;  %v533_v62 = vadd.f32 -0.32239646, %v525_v59  ;;  %v536_v29 = vmul.f32 %v528_v31, %v1212_v15 }
  0x8d   :  { %v534_v32 = vadd.f32 -0.32239646, %v526_v58  ;;  %v537_v43 = vmul.f32 %v529_v51, %v1225_v19  ;;  %v543_v45 = vadd.f32 -2.4007583, %v535_v38  ;;  %v388_v41 = vadd.f32 -13.280682, %v1157_v10 }
  0x8e   :  { %v538_v50 = vmul.f32 %v530_v2, %v1233_v24  ;;  %v539_v27 = vmul.f32 %v531_v14, %v1242_v47  ;;  %v540_v46 = vmul.f32 %v532_v37, %v1251_v25  ;;  %v389_v1 = vadd.f32 -13.280682, %v1161_v3 }
  0x8f   :  { %v390_v28 = vadd.f32 -13.280682, %v1164_v4  ;;  %v393_v5 = vmul.f32 %v1171_v63, %v977_v6  ;;  %v541_v39 = vmul.f32 %v533_v62, %v1259_v34  ;;  %v394_v31 = vmul.f32 %v386_v7, %v982_v8 }
  0x90   :  { %v395_v17 = vmul.f32 %v387_v20, %v986_v9  ;;  %v399_v10 = vadd.f32 1.0, %v391_v23  ;;  %v542_v51 = vmul.f32 %v534_v32, %v1267_v42  ;;  %v400_v59 = vadd.f32 1.0, %v392_v11 }
  0x91   :  { %v544_v2 = vadd.f32 -2.4007583, %v536_v29  ;;  %v545_v14 = vadd.f32 -2.4007583, %v537_v43  ;;  %v551_v58 = vmul.f32 %v543_v45, %v1199_v52  ;;  %v546_v3 = vadd.f32 -2.4007583, %v538_v50 }
  0x92   :  { %v547_v37 = vadd.f32 -2.4007583, %v539_v27  ;;  %v548_v4 = vadd.f32 -2.4007583, %v540_v46  ;;  %v1296_v6 = vstv %s1475_s1  ;;  %v396_v8 = vmul.f32 %v388_v41, %v992_v12  ;;  %s891_s1 = smov [#allocation7]  }
  0x93   :  { %1485 = vst [vmem:[#allocation14_spill] sm:$0xff] %v1296_v6  ;;  %v397_v9 = vmul.f32 %v389_v1, %v996_v13  ;;  %v401_v63 = vadd.f32 1.0, %v393_v5  ;;  %v549_v7 = vadd.f32 -2.4007583, %v541_v39  ;;  %v398_v38 = vmul.f32 %v390_v28, %v1002_v16  ;;  %s759_s27 = sshll.u32 %s891_s1, 4  ;;  %s760_s27 = int_to_ptr.vmem [resolvable:$true] %s759_s27 }
  0x94   :  { %v402_v20 = vadd.f32 1.0, %v394_v31  ;;  %v403_v23 = vadd.f32 1.0, %v395_v17  ;;  %v550_v11 = vadd.f32 -2.4007583, %v542_v51  ;;  %810 = vrcp.f32 %v399_v10  ;;  %s864_s28 = scalar_lea.vmem %s760_s27, 1024  ;;  %p869_p9 = scmp.lt.s32.totalorder %s760_s27, %s760_s27 }
  0x95   :  { %v552_v62 = vmul.f32 %v544_v2, %v1212_v15  ;;  %v553_v32 = vmul.f32 %v545_v14, %v1225_v19  ;;  %v559_v29 = vadd.f32 -2.5497324, %v551_v58  ;;  %812 = vrcp.f32 %v400_v59  ;;  %p865_p8 = scmp.ne.s32.totalorder %s760_s27, %s864_s28  ;;  %p870_p10 = scmp.lt.s32.totalorder %s864_s28, %s864_s28 }
  0x96   :  { %v554_v43 = vmul.f32 %v546_v3, %v1233_v24  ;;  %v555_v12 = vmul.f32 %v547_v37, %v1242_v47  ;;  %v556_v13 = vmul.f32 %v548_v4, %v1251_v25  ;;  %v404_v45 = vadd.f32 1.0, %v396_v8 }
  0x97   :  { %v405_v41 = vadd.f32 1.0, %v397_v9  ;;  %814 = vrcp.f32 %v401_v63  ;;  %v557_v16 = vmul.f32 %v549_v7, %v1259_v34  ;;  %v406_v50 = vadd.f32 1.0, %v398_v38  ;;  %p871_p11 = por %p870_p10, %p869_p9 }
  0x98   :  { %816 = vrcp.f32 %v402_v20  ;;  %v558_v27 = vmul.f32 %v550_v11, %v1267_v42  ;;  %v599_v46 = vmul.f32 0.007784696, %v1199_v52  ;;  %v560_v1 = vadd.f32 -2.5497324, %v552_v62 }
  0x99   :  { %v561_v28 = vadd.f32 -2.5497324, %v553_v32  ;;  %v567_v5 = vmul.f32 %v559_v29, %v1199_v52  ;;  %v600_v39 = vmul.f32 0.007784696, %v1212_v15  ;;  %818 = vrcp.f32 %v403_v23  ;;  %p872_p12 = pnand %p871_p11, %p865_p8 }
  0x9a   :  { %v562_v31 = vadd.f32 -2.5497324, %v554_v43  ;;  %v563_v17 = vadd.f32 -2.5497324, %v555_v12  ;;  %v1311_v10 = vadd.f32 -2.5497324, %v556_v13  ;;  %820 = vrcp.f32 %v404_v45 }
  0x9b   :  { %v1313_v51 = vadd.f32 -2.5497324, %v557_v16  ;;  %v601_v59 = vmul.f32 0.007784696, %v1225_v19  ;;  %v602_v2 = vmul.f32 0.007784696, %v1233_v24  ;;  %822 = vrcp.f32 %v405_v41 }
  0x9c   :  { %v1317_v14 = vadd.f32 -2.5497324, %v558_v27  ;;  %v603_v58 = vmul.f32 0.007784696, %v1242_v47  ;;  %v604_v3 = vmul.f32 0.007784696, %v1251_v25  ;;  %824 = vrcp.f32 %v406_v50 }
  0x9d   :  { %v1321_v37 = vadd.f32 4.3746643, %v567_v5  ;;  %v605_v4 = vmul.f32 0.007784696, %v1259_v34  ;;  %v606_v8 = vmul.f32 0.007784696, %v1267_v42  ;;  %v1326_v9 = vmul.f32 %v560_v1, %v1212_v15 }
  0x9e   :  { %v607_v63 = vadd.f32 0.32246712, %v599_v46  ;;  %v608_v7 = vadd.f32 0.32246712, %v600_v39  ;;  %v609_v38 = vadd.f32 0.32246712, %v601_v59  ;;  %v1328_v20 = vpop.eup %810  ;;  %v1331_v23 = vmul.f32 %v561_v28, %v1225_v19 }
  0x9f   :  { %v610_v11 = vadd.f32 0.32246712, %v602_v2  ;;  %v611_v62 = vadd.f32 0.32246712, %v603_v58  ;;  %v612_v32 = vadd.f32 0.32246712, %v604_v3  ;;  %v1333_v29 = vpop.eup %812  ;;  %v570_v2 = vmul.f32 %v562_v31, %v1233_v24 }
  0xa0   :  { %v613_v43 = vadd.f32 0.32246712, %v605_v4  ;;  %v614_v12 = vadd.f32 0.32246712, %v606_v8  ;;  %v615_v13 = vmul.f32 %v607_v63, %v1199_v52  ;;  %v616_v45 = vmul.f32 %v608_v7, %v1212_v15 }
  0xa1   :  { %v1337_v41 = vpop.eup %814  ;;  %v617_v16 = vmul.f32 %v609_v38, %v1225_v19  ;;  %v618_v50 = vmul.f32 %v610_v11, %v1233_v24  ;;  %v619_v27 = vmul.f32 %v611_v62, %v1242_v47  ;;  %v620_v46 = vmul.f32 %v612_v32, %v1251_v25 }
  0xa2   :  { %v1343_v1 = vpop.eup %816  ;;  %v621_v28 = vmul.f32 %v613_v43, %v1259_v34  ;;  %v622_v5 = vmul.f32 %v614_v12, %v1267_v42  ;;  %v623_v39 = vadd.f32 2.4451342, %v615_v13  ;;  %v624_v59 = vadd.f32 2.4451342, %v616_v45 }
  0xa3   :  { %v625_v58 = vadd.f32 2.4451342, %v617_v16  ;;  %v626_v3 = vadd.f32 2.4451342, %v618_v50  ;;  %v627_v4 = vadd.f32 2.4451342, %v619_v27  ;;  %v1348_v8 = vpop.eup %818 }
  0xa4   :  { %v628_v63 = vadd.f32 2.4451342, %v620_v46  ;;  %v629_v7 = vadd.f32 2.4451342, %v621_v28  ;;  %v630_v38 = vadd.f32 2.4451342, %v622_v5  ;;  %v631_v11 = vmul.f32 %v623_v39, %v1199_v52  ;;  %v1351_v62 = vpop.eup %820 }
  0xa5   :  { %v632_v32 = vmul.f32 %v624_v59, %v1212_v15  ;;  %v633_v43 = vmul.f32 %v625_v58, %v1225_v19  ;;  %v634_v12 = vmul.f32 %v626_v3, %v1233_v24  ;;  %v635_v31 = vmul.f32 %v627_v4, %v1242_v47  ;;  %v1357_v13 = vpop.eup %822 }
  0xa6   :  { %1486 = vst [vmem:[#allocation15_spill] sm:$0xff] %v1357_v13  ;;  %v636_v45 = vmul.f32 %v628_v63, %v1251_v25  ;;  %v637_v16 = vmul.f32 %v629_v7, %v1259_v34  ;;  %v638_v50 = vmul.f32 %v630_v38, %v1267_v42  ;;  %v639_v27 = vadd.f32 3.7544086, %v631_v11  ;;  %v1362_v46 = vpop.eup %824 }
  0xa7   :  { %1487 = vst [vmem:[#allocation16_spill] sm:$0xff] %v1362_v46  ;;  %v571_v28 = vmul.f32 %v563_v17, %v1242_v47  ;;  %v640_v5 = vadd.f32 3.7544086, %v632_v32  ;;  %v641_v39 = vadd.f32 3.7544086, %v633_v43  ;;  %vm681_vm2 = vcmp.gt.f32.partialorder %v931_v54, 0.5 }
  0xa8   :  { %v642_v59 = vadd.f32 3.7544086, %v634_v12  ;;  %v643_v58 = vadd.f32 3.7544086, %v635_v31  ;;  %v644_v3 = vadd.f32 3.7544086, %v636_v45  ;;  %v647_v4 = vmul.f32 %v639_v27, %v1199_v52 }
  0xa9   :  { %v645_v6 = vadd.f32 3.7544086, %v637_v16  ;;  %v646_v13 = vadd.f32 3.7544086, %v638_v50  ;;  %v648_v63 = vmul.f32 %v640_v5, %v1212_v15  ;;  %v649_v7 = vmul.f32 %v641_v39, %v1225_v19  ;;  %v1494_v54 = vld [vmem:[#allocation14_spill] sm:$0xff] }
  0xaa   :  { %v650_v38 = vmul.f32 %v642_v59, %v1233_v24  ;;  %v651_v11 = vmul.f32 %v643_v58, %v1242_v47  ;;  %v652_v46 = vmul.f32 %v644_v3, %v1251_v25  ;;  %v655_v32 = vadd.f32 1.0, %v647_v4 }
  0xab   :  { %v653_v17 = vmul.f32 %v645_v6, %v1259_v34  ;;  %v654_v43 = vmul.f32 %v646_v13, %v1267_v42  ;;  %v656_v12 = vadd.f32 1.0, %v648_v63  ;;  %v657_v31 = vadd.f32 1.0, %v649_v7 }
  0xac   :  { %v658_v45 = vadd.f32 1.0, %v650_v38  ;;  %v572_v16 = vmul.f32 %v1311_v10, %v1251_v25  ;;  %v576_v50 = vadd.f32 4.3746643, %v1326_v9  ;;  %v659_v27 = vadd.f32 1.0, %v651_v11 }
  0xad   :  { %826 = vrcp.f32 %v655_v32  ;;  %v573_v5 = vmul.f32 %v1313_v51, %v1259_v34  ;;  %v577_v39 = vadd.f32 4.3746643, %v1331_v23  ;;  %v660_v59 = vadd.f32 1.0, %v652_v46 }
  0xae   :  { %828 = vrcp.f32 %v656_v12  ;;  %v574_v6 = vmul.f32 %v1317_v14, %v1267_v42  ;;  %v578_v13 = vadd.f32 4.3746643, %v570_v2  ;;  %v661_v58 = vadd.f32 1.0, %v653_v17 }
  0xaf   :  { %830 = vrcp.f32 %v657_v31  ;;  %v579_v3 = vadd.f32 4.3746643, %v571_v28  ;;  %v583_v10 = vmul.f32 %v1321_v37, %v1199_v52  ;;  %v662_v9 = vadd.f32 1.0, %v654_v43  ;;  %v1488_v31 = vld [vmem:[#allocation10_spill] sm:$0xff] }
  0xb0   :  { %832 = vrcp.f32 %v658_v45  ;;  %v580_v4 = vadd.f32 4.3746643, %v572_v16  ;;  %v584_v63 = vmul.f32 %v576_v50, %v1212_v15  ;;  %v581_v51 = vadd.f32 4.3746643, %v573_v5  ;;  %v1491_v5 = vld [vmem:[#allocation15_spill] sm:$0xff] }
  0xb1   :  { %834 = vrcp.f32 %v659_v27  ;;  %v585_v23 = vmul.f32 %v577_v39, %v1225_v19  ;;  %v582_v14 = vadd.f32 4.3746643, %v574_v6  ;;  %v586_v2 = vmul.f32 %v578_v13, %v1233_v24  ;;  %v1490_v27 = vld [vmem:[#allocation12_spill] sm:$0xff] }
  0xb2   :  { %836 = vrcp.f32 %v660_v59  ;;  %v587_v52 = vmul.f32 %v579_v3, %v1242_v47  ;;  %v591_v37 = vadd.f32 2.938164, %v583_v10  ;;  %vm682_vm3 = vcmp.gt.f32.partialorder %v936_v56, 0.5 }
  0xb3   :  { %838 = vrcp.f32 %v661_v58  ;;  %vm703_vm4 = vcmp.lt.f32.partialorder %v1051_v18, 0.02425  ;;  %v588_v15 = vmul.f32 %v580_v4, %v1251_v25  ;;  %v592_v19 = vadd.f32 2.938164, %v584_v63 }
  0xb4   :  { %840 = vrcp.f32 %v662_v9  ;;  %vm683_vm5 = vcmp.gt.f32.partialorder %v938_v57, 0.5  ;;  %vm704_vm6 = vcmp.lt.f32.partialorder %v1056_v22, 0.02425  ;;  %vm705_vm7 = vcmp.lt.f32.partialorder %v1061_v26, 0.02425 }
  0xb5   :  { %v589_v24 = vmul.f32 %v581_v51, %v1259_v34  ;;  %v593_v46 = vadd.f32 2.938164, %v585_v23  ;;  %vm684_vm8 = vcmp.gt.f32.partialorder %v946_v60, 0.5  ;;  %vm706_vm9 = vcmp.lt.f32.partialorder %v1065_v30, 0.02425 }
  0xb6   :  { %vm707_vm10 = vcmp.lt.f32.partialorder %v1070_v33, 0.02425  ;;  %v408_v25 = vmul.f32 %v1328_v20, %v1095_v21  ;;  %v590_v28 = vmul.f32 %v582_v14, %v1267_v42  ;;  %v594_v7 = vadd.f32 2.938164, %v586_v2 }
  0xb7   :  { %v827_v47 = vpop.eup %826  ;;  %vm685_vm11 = vcmp.gt.f32.partialorder %v948_v61, 0.5  ;;  %vm708_vm12 = vcmp.lt.f32.partialorder %v1075_v36, 0.02425  ;;  %v410_v34 = vmul.f32 %v1333_v29, %v1102_v40  ;;  %v412_v11 = vmul.f32 %v1337_v41, %v1105_v55  ;;  %v1489_v29 = vld [vmem:[#allocation11_spill] sm:$0xff] }
  0xb8   :  { %v829_v38 = vpop.eup %828  ;;  %v595_v17 = vadd.f32 2.938164, %v587_v52  ;;  %v664_v32 = vmul.f32 %v827_v47, %v591_v37  ;;  %vm686_vm13 = vcmp.gt.f32.partialorder %v956_v0, 0.5  ;;  %vm709_vm14 = vcmp.lt.f32.partialorder %v1080_v44, 0.02425 }
  0xb9   :  { %v831_v21 = vpop.eup %830  ;;  %v414_v42 = vmul.f32 %v1343_v1, %v1109_v35  ;;  %v416_v20 = vmul.f32 %v1348_v8, %v1112_v48  ;;  %v596_v43 = vadd.f32 2.938164, %v588_v15  ;;  %v666_v12 = vmul.f32 %v829_v38, %v592_v19  ;;  %v1492_v48 = vld [vmem:[#allocation13_spill] sm:$0xff]  ;;  %v1493_v8 = vld [vmem:[#allocation16_spill] sm:$0xff] }
  0xba   :  { %vm710_vm15 = vcmp.lt.f32.partialorder %v1488_v31, 0.02425  ;;  %v833_v40 = vpop.eup %832  ;;  %v418_v55 = vmul.f32 %v1351_v62, %v1489_v29  ;;  %v597_v41 = vadd.f32 2.938164, %v589_v24  ;;  %v668_v45 = vmul.f32 %v831_v21, %v593_v46  ;;  %v721_v38 = vld [vmem:[#allocation4 + $0x10] sm:$0xff]  ;;  %v724_v21 = vld [vmem:[#allocation4 + $0x28] sm:$0xff] }
  0xbb   :  { %v687_v16 = vsub.f32 0.0, %v664_v32  ;;  %v835_v50 = vpop.eup %834  ;;  %v420_v39 = vmul.f32 %v1491_v5, %v1490_v27  ;;  %v598_v59 = vadd.f32 2.938164, %v590_v28  ;;  %v670_v35 = vmul.f32 %v833_v40, %v594_v7  ;;  %v719_v28 = vld [vmem:[#allocation4] sm:$0xff]  ;;  %v720_v7 = vld [vmem:[#allocation4 + $0x8] sm:$0xff] }
  0xbc   :  { %v688_v1 = vsub.f32 0.0, %v666_v12  ;;  %v837_v6 = vpop.eup %836  ;;  %v422_v13 = vmul.f32 %v1493_v8, %v1492_v48  ;;  %v672_v58 = vmul.f32 %v835_v50, %v595_v17  ;;  %v689_v3 = vsub.f32 0.0, %v668_v45 }
  0xbd   :  { %v695_v10 = vsel %vm679_vm0, %v687_v16, %v664_v32  ;;  %v839_v62 = vpop.eup %838  ;;  %v674_v9 = vmul.f32 %v837_v6, %v596_v43  ;;  %v690_v4 = vsub.f32 0.0, %v670_v35  ;;  %v726_v43 = vld [vmem:[#allocation4 + $0x38] sm:$0xff] }
  0xbe   :  { %v696_v63 = vsel %vm680_vm1, %v688_v1, %v666_v12  ;;  %v711_v51 = vsel %vm703_vm4, %v695_v10, %v408_v25  ;;  %v841_v23 = vpop.eup %840  ;;  %v676_v14 = vmul.f32 %v839_v62, %v597_v41  ;;  %v691_v2 = vsub.f32 0.0, %v672_v58 }
  0xbf   :  { %v697_v52 = vsel %vm681_vm2, %v689_v3, %v668_v45  ;;  %v712_v37 = vsel %vm704_vm6, %v696_v63, %v410_v34  ;;  %v678_v49 = vmul.f32 %v841_v23, %v598_v59  ;;  %v692_v15 = vsub.f32 0.0, %v674_v9  ;;  %v722_v34 = vld [vmem:[#allocation4 + $0x18] sm:$0xff] }
  0xc0   :  { %v698_v19 = vsel %vm682_vm3, %v690_v4, %v670_v35  ;;  %v713_v53 = vsel %vm705_vm7, %v697_v52, %v412_v11  ;;  %v693_v24 = vsub.f32 0.0, %v676_v14  ;;  %v699_v18 = vsel %vm683_vm5, %v691_v2, %v672_v58  ;;  %v723_v11 = vld [vmem:[#allocation4 + $0x20] sm:$0xff] }
  0xc1   :  { %v714_v46 = vsel %vm706_vm9, %v698_v19, %v414_v42  ;;  %v729_v47 = vmul.f32 %v1494_v54, %v711_v51  ;;  %v694_v25 = vsub.f32 0.0, %v678_v49  ;;  %v700_v22 = vsel %vm684_vm8, %v692_v15, %v674_v9  ;;  %v725_v42 = vld [vmem:[#allocation4 + $0x30] sm:$0xff] }
  0xc2   :  { %v715_v56 = vsel %vm707_vm10, %v699_v18, %v416_v20  ;;  %v730_v26 = vmul.f32 %v1494_v54, %v712_v37  ;;  %v701_v57 = vsel %vm685_vm11, %v693_v24, %v676_v14  ;;  %v716_v30 = vsel %vm708_vm12, %v700_v22, %v418_v55 }
  0xc3   :  { %v731_v17 = vmul.f32 %v1494_v54, %v713_v53  ;;  %v732_v60 = vmul.f32 %v1494_v54, %v714_v46  ;;  %v702_v33 = vsel %vm686_vm13, %v694_v25, %v678_v49  ;;  %v717_v32 = vsel %vm709_vm14, %v701_v57, %v420_v39 }
  0xc4   :  { %v733_v61 = vmul.f32 %v1494_v54, %v715_v56  ;;  %v734_v36 = vmul.f32 %v1494_v54, %v716_v30  ;;  %v718_v20 = vsel %vm710_vm15, %v702_v33, %v422_v13  ;;  %v735_v12 = vmul.f32 %v1494_v54, %v717_v32 }
  0xc5   :  { %v737_v40 = vadd.f32 %v729_v47, %v719_v28  ;;  %v738_v29 = vadd.f32 %v730_v26, %v720_v7  ;;  %v736_v0 = vmul.f32 %v1494_v54, %v718_v20  ;;  %v739_v44 = vadd.f32 %v731_v17, %v721_v38 }
  0xc6   :  { %v740_v55 = vadd.f32 %v732_v60, %v722_v34  ;;  %v741_v41 = vadd.f32 %v733_v61, %v723_v11  ;;  %v742_v45 = vadd.f32 %v734_v36, %v724_v21  ;;  %v743_v16 = vadd.f32 %v735_v12, %v725_v42 }
  0xc7   :  { %745 = vst [vmem:[#allocation7] sm:$0xff] %v737_v40  ;;  %746 = vst [vmem:[#allocation7 + $0x8] sm:$0xff] %v738_v29  ;;  %v744_v50 = vadd.f32 %v736_v0, %v726_v43 }
  0xc8   :  { %747 = vst [vmem:[#allocation7 + $0x10] sm:$0xff] %v739_v44  ;;  %748 = vst [vmem:[#allocation7 + $0x18] sm:$0xff] %v740_v55 }
  0xc9   :  { %749 = vst [vmem:[#allocation7 + $0x20] sm:$0xff] %v741_v41  ;;  %750 = vst [vmem:[#allocation7 + $0x28] sm:$0xff] %v742_v45 }
  0xca   :  { %751 = vst [vmem:[#allocation7 + $0x30] sm:$0xff] %v743_v16  ;;  %752 = vst [vmem:[#allocation7 + $0x38] sm:$0xff] %v744_v50 }
  0xcb   :  { %875 = shalt.err (!%p872_p12)
}
  0xcc   :  { %s876_s4 = scalar_lea.hbm %s1477_s3, 1024 }
  0xcd   :  { %p877_p13 = scmp.ne.s32.totalorder %s1477_s3, %s876_s4  ;;  %p880_p0 = scmp.lt.u32.totalorder %s876_s4, %s1477_s3 }
  0xcf   :  { %p882_p1 = pnand %p880_p0, %p877_p13 }
  0xd1   :  { %885 = shalt.err (!%p882_p1)
}
  0xd2   :  { %762 = dma.vmem_to_hbm [thread:$0]  %s760_s27, 1024, %s1477_s3, [#allocation6]  }
  0xd3   :  { %888 = dma.done.wait [#allocation6], 1024  }
  0xd4   :  { %889 = vsyncadd [#allocation6], 4294966272 }
  0xd5   :  { %766 = vsyncpa [#allocation5], 1 }
  0xd6   :  { %767 = vsyncpa [#allocation6], 1 }

</bundles_post_ra>
